<compile_context>
chip_gen: v7x
topology: tpu7x:2x2x1
jax: 0.10.0
libtpu: 0.0.40
codegen_flags: <defaults>
</compile_context>

<pallas_src>
import functools

import jax
import jax.numpy as jnp
from jax.experimental import pallas as pl
from jax.experimental.pallas import tpu as pltpu

EPS = 1e-6  # torch pairwise_distance default eps (added to the difference)


def _triplet_loss_kernel(a_ref, p_ref, n_ref, out_ref, *, n_rows, row_tile,
                         steps_per_core, margin, padded, reduce_via_mxu):
    c = pl.program_id(0)   # TensorCore split ("parallel")
    i = pl.program_id(1)   # per-core batch steps ("arbitrary", accumulation axis)

    @pl.when(i == 0)
    def _init():
        out_ref[...] = jnp.zeros_like(out_ref)

    a = a_ref[...]
    p = p_ref[...]
    n = n_ref[...]
    if a.dtype != jnp.float32:  # upcast only when needed (e.g. bf16 inputs)
        a = a.astype(jnp.float32)
        p = p.astype(jnp.float32)
        n = n.astype(jnp.float32)

    # PyTorch: dist = || x1 - x2 + eps ||_2  (eps added to the difference)
    diff_ap = a - p + EPS
    diff_an = a - n + EPS
    sq_ap = diff_ap * diff_ap
    sq_an = diff_an * diff_an

    if reduce_via_mxu:
        # Route the per-row reduction through the idle MXU instead of the XLU:
        # (TN, D) @ (D, 128) ones -> every lane holds the row sum; take lane 0.
        dim = a.shape[-1]
        ones = jnp.ones((dim, 128), jnp.float32)
        s_ap = jnp.dot(sq_ap, ones, preferred_element_type=jnp.float32)[:, :1]
        s_an = jnp.dot(sq_an, ones, preferred_element_type=jnp.float32)[:, :1]
    else:
        s_ap = jnp.sum(sq_ap, axis=-1, keepdims=True)  # (TN, 1), XLU reduce
        s_an = jnp.sum(sq_an, axis=-1, keepdims=True)

    d_ap = jnp.sqrt(s_ap)  # EUP
    d_an = jnp.sqrt(s_an)
    hinge = jnp.maximum(d_ap - d_an + margin, 0.0)  # (TN, 1)

    if not padded:
        # No padding anywhere in the (core, step) coverage: plain accumulate.
        out_ref[...] += jnp.sum(hinge, keepdims=True)
    else:
        # Mask only on tiles that overhang n_rows (partial / phantom tiles).
        row0 = (c * steps_per_core + i) * row_tile
        is_partial = row0 + row_tile > n_rows

        @pl.when(jnp.logical_not(is_partial))
        def _full_tile():
            out_ref[...] += jnp.sum(hinge, keepdims=True)

        @pl.when(is_partial)
        def _partial_tile():
            row = jax.lax.broadcasted_iota(jnp.int32, hinge.shape, 0)
            masked = jnp.where(row0 + row < n_rows, hinge, 0.0)
            out_ref[...] += jnp.sum(masked, keepdims=True)


def _vmem_config():
    """Return (vmem_capacity, pipeline_budget_bytes, vmem_limit_bytes)."""
    cap = None
    try:
        info = pltpu.get_tpu_info()
        cap = int(getattr(info, "vmem_capacity_bytes", 0)) or None
    except Exception:
        cap = None
    if cap is None:
        cap = 64 * 1024 * 1024  # conservative fallback (treat unknown as v7x-sized)
    if cap >= 100 * 1024 * 1024:
        # v5e / v6e: 128 MiB physical VMEM -> generous pipeline budget.
        return cap, 28 * 1024 * 1024, 64 * 1024 * 1024
    # v7x: 64 MiB physical VMEM -> tighter budget, explicit limit with headroom
    # for the f32 elementwise intermediates.
    return cap, 14 * 1024 * 1024, min(40 * 1024 * 1024, cap - 8 * 1024 * 1024)


def _num_tensorcores():
    """Best-effort TC-per-chip query (2 on v7x, 1 on v5e/v6e); safe fallback 1."""
    try:
        info = pltpu.get_tpu_info()
        for name in ("num_tensorcores", "tensorcores_per_chip", "num_cores",
                     "core_count"):
            v = getattr(info, name, None)
            if v:
                return max(1, int(v))
    except Exception:
        pass
    try:
        return max(1, int(getattr(jax.devices()[0], "num_cores", 1) or 1))
    except Exception:
        return 1


def _pick_row_tile(dim, itemsize, sub, pipeline_budget_bytes):
    """Largest row tile (multiple of `sub`) whose streamed + compute footprint fits."""
    bytes_per_row = 3 * 2 * dim * itemsize   # 3 streamed inputs x 2 pipeline buffers
    bytes_per_row += 6 * dim * 4             # f32 diff/square intermediates headroom
    tile = (pipeline_budget_bytes // max(1, bytes_per_row)) // sub * sub
    return max(sub, min(tile, 8192))


def triplet_loss(anchor, positive, negative, *, margin=1.0, row_tile=None,
                 num_cores=None, reduce_via_mxu=None, input_buffering=None):
    assert anchor.shape == positive.shape == negative.shape
    assert anchor.ndim == 2, "expected (N, D) embeddings"
    n_rows, dim = anchor.shape
    itemsize = jnp.dtype(anchor.dtype).itemsize
    # Native sublane multiple for the input dtype (packed sublanes for <32-bit).
    sub = {4: 8, 2: 16, 1: 32}.get(itemsize, 8)

    vmem_cap, pipeline_budget, vmem_limit = _vmem_config()
    if reduce_via_mxu is None:
        # Small-VMEM chips (v7x) have the fast HBM where the XLU reduce binds.
        reduce_via_mxu = vmem_cap < 100 * 1024 * 1024

    if row_tile is None:
        row_tile = _pick_row_tile(dim, itemsize, sub, pipeline_budget)
    # Unconditional dtype-aware rounding + clamping (layout legality even for
    # caller-supplied tiles).
    row_tile = max(sub, (int(row_tile) // sub) * sub)
    if row_tile >= n_rows:
        row_tile = n_rows  # single full block covering the batch is always legal
    n_blocks = pl.cdiv(n_rows, row_tile)

    if num_cores is None:
        num_cores = _num_tensorcores()
    num_cores = max(1, min(int(num_cores), n_blocks))
    steps_per_core = pl.cdiv(n_blocks, num_cores)

    # True if any (core, step) tile overhangs n_rows (partial or phantom tile).
    padded = (num_cores * steps_per_core * row_tile) != n_rows

    def in_map(c, i):
        blk = c * steps_per_core + i
        # Clamp phantom trailing blocks so no DMA ever reads past the array;
        # their rows are fully masked in the kernel.
        return (jnp.minimum(blk, n_blocks - 1), 0)

    if input_buffering is not None and int(input_buffering) > 2:
        in_spec = pl.BlockSpec((row_tile, dim), in_map,
                               pipeline_mode=pl.Buffered(int(input_buffering)))
    else:
        in_spec = pl.BlockSpec((row_tile, dim), in_map)

    kernel = functools.partial(
        _triplet_loss_kernel,
        n_rows=n_rows, row_tile=row_tile, steps_per_core=steps_per_core,
        margin=float(margin), padded=padded, reduce_via_mxu=bool(reduce_via_mxu))

    partials = pl.pallas_call(
        kernel,
        out_shape=jax.ShapeDtypeStruct((num_cores, 1), jnp.float32),
        grid_spec=pltpu.PrefetchScalarGridSpec(
            num_scalar_prefetch=0,
            grid=(num_cores, steps_per_core),
            in_specs=[in_spec, in_spec, in_spec],
            out_specs=pl.BlockSpec((1, 1), lambda c, i: (c, 0)),
        ),
        compiler_params=pltpu.CompilerParams(
            dimension_semantics=("parallel", "arbitrary"),
            vmem_limit_bytes=int(vmem_limit),
        ),
        cost_estimate=pl.CostEstimate(
            flops=10 * n_rows * dim,
            transcendentals=2 * n_rows,
            bytes_accessed=3 * n_rows * dim * itemsize + 4 * num_cores,
        ),
    )(anchor, positive, negative)

    # Combine per-core partial sums and take the batch mean.
    return jnp.sum(partials) * (1.0 / n_rows)


def triplet_loss_ref(anchor, positive, negative, margin=1.0):
    # Pure-JAX reference matching torch.nn.TripletMarginLoss semantics.
    d_ap = jnp.sqrt(jnp.sum((anchor - positive + EPS) ** 2, axis=-1))
    d_an = jnp.sqrt(jnp.sum((anchor - negative + EPS) ** 2, axis=-1))
    return jnp.mean(jnp.maximum(d_ap - d_an + margin, 0.0))


if __name__ == "__main__":
    key = jax.random.PRNGKey(0)
    k1, k2, k3 = jax.random.split(key, 3)

    # Small but lane-dense shapes; N not a multiple of the forced tile so the
    # partial-tile masking path is exercised.
    N, D = 72, 128
    anchor = jax.random.normal(k1, (N, D), dtype=jnp.float32)
    positive = jax.random.normal(k2, (N, D), dtype=jnp.float32)
    negative = jax.random.normal(k3, (N, D), dtype=jnp.float32)

    ref = triplet_loss_ref(anchor, positive, negative)

    # 1) Default path: auto-sized tile / auto core count / auto reduce mode
    #    (single full block here since the batch is tiny).
    loss_auto = triplet_loss(anchor, positive, negative)
    jax.block_until_ready(loss_auto)
    assert jnp.allclose(loss_auto, ref, atol=1e-5, rtol=1e-5), (loss_auto, ref)

    # 2) Forced small tile + explicit 2-core split + XLU reduce: exercises the
    #    multi-step grid, per-core partial sums, clamped index_map, and the
    #    full / partial / phantom tile masking (72 rows, 16-row tiles, 2 cores).
    loss_tiled = triplet_loss(anchor, positive, negative, row_tile=16,
                              num_cores=2, reduce_via_mxu=False)
    jax.block_until_ready(loss_tiled)
    assert jnp.allclose(loss_tiled, ref, atol=1e-5, rtol=1e-5), (loss_tiled, ref)

    # 3) Same tiling with the MXU row-reduction path (v7x-oriented).
    loss_mxu = triplet_loss(anchor, positive, negative, row_tile=16,
                            num_cores=2, reduce_via_mxu=True)
    jax.block_until_ready(loss_mxu)
    assert jnp.allclose(loss_mxu, ref, atol=1e-5, rtol=1e-5), (loss_mxu, ref)

    print("KERNEL_OK")
</pallas_src>

<mosaic_0001>
module attributes {stable_mosaic.version = 11 : i64} {
  func.func @_triplet_loss_kernel(%arg0: i32, %arg1: i32, %arg2: memref<72x128xf32, #tpu.memory_space<vmem>>, %arg3: memref<72x128xf32, #tpu.memory_space<vmem>>, %arg4: memref<72x128xf32, #tpu.memory_space<vmem>>, %arg5: memref<1x1xf32, #tpu.memory_space<vmem>>) attributes {dimension_semantics = [#tpu.dimension_semantics<parallel>, #tpu.dimension_semantics<arbitrary>], iteration_bounds = array<i64: 1, 1>, scalar_prefetch = 0 : i64, scratch_operands = 0 : i64, tpu.core_type = #tpu.core_type<tc>, window_params = [{transform_indices = @transform_0, window_bounds = array<i64: 72, 128>}, {transform_indices = @transform_1, window_bounds = array<i64: 72, 128>}, {transform_indices = @transform_2, window_bounds = array<i64: 72, 128>}, {transform_indices = @transform_3, window_bounds = array<i64: 1, 1>}]} {
    %c0_i32 = arith.constant 0 : i32
    %0 = arith.cmpi eq, %arg1, %c0_i32 : i32
    %1 = arith.extui %0 : i1 to i32
    %c0_i32_0 = arith.constant 0 : i32
    %2 = arith.cmpi ne, %1, %c0_i32_0 : i32
    scf.if %2 {
      %cst_17 = arith.constant 0.000000e+00 : f32
      %34 = vector.broadcast %cst_17 : f32 to vector<1x1xf32>
      %c0_18 = arith.constant 0 : index
      %c0_19 = arith.constant 0 : index
      %35 = vector.load %arg5[%c0_18, %c0_19] : memref<1x1xf32, #tpu.memory_space<vmem>>, vector<1x1xf32>
      tpu.vector_store %arg5[%c0_18, %c0_19], %34 {strides = array<i32>} : memref<1x1xf32, #tpu.memory_space<vmem>>, vector<1x1xf32>,
    } else {
    }
    %c0 = arith.constant 0 : index
    %c0_1 = arith.constant 0 : index
    %3 = vector.load %arg2[%c0, %c0_1] : memref<72x128xf32, #tpu.memory_space<vmem>>, vector<72x128xf32>
    %c0_2 = arith.constant 0 : index
    %c0_3 = arith.constant 0 : index
    %4 = vector.load %arg3[%c0_2, %c0_3] : memref<72x128xf32, #tpu.memory_space<vmem>>, vector<72x128xf32>
    %c0_4 = arith.constant 0 : index
    %c0_5 = arith.constant 0 : index
    %5 = vector.load %arg4[%c0_4, %c0_5] : memref<72x128xf32, #tpu.memory_space<vmem>>, vector<72x128xf32>
    %6 = arith.subf %3, %4 : vector<72x128xf32>
    %cst = arith.constant 9.99999997E-7 : f32
    %7 = vector.broadcast %cst : f32 to vector<72x128xf32>
    %8 = arith.addf %6, %7 : vector<72x128xf32>
    %9 = arith.subf %3, %5 : vector<72x128xf32>
    %cst_6 = arith.constant 9.99999997E-7 : f32
    %10 = vector.broadcast %cst_6 : f32 to vector<72x128xf32>
    %11 = arith.addf %9, %10 : vector<72x128xf32>
    %12 = arith.mulf %8, %8 : vector<72x128xf32>
    %13 = arith.mulf %11, %11 : vector<72x128xf32>
    %cst_7 = arith.constant 1.000000e+00 : f32
    %14 = vector.broadcast %cst_7 : f32 to vector<128x128xf32>
    %cst_8 = arith.constant dense<0.000000e+00> : vector<72x128xf32>
    %15 = tpu.matmul %12, %14, %cst_8 {dimension_numbers = #tpu.dot_dimension_numbers<[1], [0], [0], [1], [0, 0, 1, 1], [], []>} : vector<72x128xf32>, vector<128x128xf32>, vector<72x128xf32> -> vector<72x128xf32>
    %16 = vector.extract_strided_slice %15 {offsets = [0, 0], sizes = [72, 1], strides = [1, 1]} : vector<72x128xf32> to vector<72x1xf32>
    %cst_9 = arith.constant dense<0.000000e+00> : vector<72x128xf32>
    %17 = tpu.matmul %13, %14, %cst_9 {dimension_numbers = #tpu.dot_dimension_numbers<[1], [0], [0], [1], [0, 0, 1, 1], [], []>} : vector<72x128xf32>, vector<128x128xf32>, vector<72x128xf32> -> vector<72x128xf32>
    %18 = vector.extract_strided_slice %17 {offsets = [0, 0], sizes = [72, 1], strides = [1, 1]} : vector<72x128xf32> to vector<72x1xf32>
    %19 = math.sqrt %16 : vector<72x1xf32>
    %20 = math.sqrt %18 : vector<72x1xf32>
    %21 = arith.subf %19, %20 : vector<72x1xf32>
    %cst_10 = arith.constant 1.000000e+00 : f32
    %22 = vector.broadcast %cst_10 : f32 to vector<72x1xf32>
    %23 = arith.addf %21, %22 : vector<72x1xf32>
    %cst_11 = arith.constant 0.000000e+00 : f32
    %24 = vector.broadcast %cst_11 : f32 to vector<72x1xf32>
    %25 = arith.maximumf %23, %24 : vector<72x1xf32>
    %c0_12 = arith.constant 0 : index
    %c0_13 = arith.constant 0 : index
    %26 = vector.load %arg5[%c0_12, %c0_13] : memref<1x1xf32, #tpu.memory_space<vmem>>, vector<1x1xf32>
    %27 = vector.shape_cast %25 : vector<72x1xf32> to vector<1x72x1xf32>
    %cst_14 = arith.constant dense<0.000000e+00> : vector<1xf32>
    %28 = vector.multi_reduction <add>, %27, %cst_14 [1, 2] : vector<1x72x1xf32> to vector<1xf32>
    %29 = vector.shape_cast %28 : vector<1xf32> to vector<1x1x1xf32>
    %30 = vector.extract %29[0, 0, 0] : f32 from vector<1x1x1xf32>
    %31 = vector.broadcast %30 : f32 to vector<1x1xf32>
    %32 = arith.addf %26, %31 : vector<1x1xf32>
    %c0_15 = arith.constant 0 : index
    %c0_16 = arith.constant 0 : index
    %33 = vector.load %arg5[%c0_15, %c0_16] : memref<1x1xf32, #tpu.memory_space<vmem>>, vector<1x1xf32>
    tpu.vector_store %arg5[%c0_15, %c0_16], %32 {strides = array<i32>} : memref<1x1xf32, #tpu.memory_space<vmem>>, vector<1x1xf32>,
    return
  }
  func.func @transform_0(%arg0: i32, %arg1: i32) -> (i32, i32) {
    %c1_i32 = arith.constant 1 : i32
    %0 = arith.muli %arg0, %c1_i32 : i32
    %1 = arith.addi %0, %arg1 : i32
    %c0_i32 = arith.constant 0 : i32
    %2 = arith.minsi %1, %c0_i32 : i32
    %c0_i32_0 = arith.constant 0 : i32
    %c0_i32_1 = arith.constant 0 : i32
    return %2, %c0_i32_0 : i32, i32
  }
  func.func @transform_1(%arg0: i32, %arg1: i32) -> (i32, i32) {
    %c1_i32 = arith.constant 1 : i32
    %0 = arith.muli %arg0, %c1_i32 : i32
    %1 = arith.addi %0, %arg1 : i32
    %c0_i32 = arith.constant 0 : i32
    %2 = arith.minsi %1, %c0_i32 : i32
    %c0_i32_0 = arith.constant 0 : i32
    %c0_i32_1 = arith.constant 0 : i32
    return %2, %c0_i32_0 : i32, i32
  }
  func.func @transform_2(%arg0: i32, %arg1: i32) -> (i32, i32) {
    %c1_i32 = arith.constant 1 : i32
    %0 = arith.muli %arg0, %c1_i32 : i32
    %1 = arith.addi %0, %arg1 : i32
    %c0_i32 = arith.constant 0 : i32
    %2 = arith.minsi %1, %c0_i32 : i32
    %c0_i32_0 = arith.constant 0 : i32
    %c0_i32_1 = arith.constant 0 : i32
    return %2, %c0_i32_0 : i32, i32
  }
  func.func @transform_3(%arg0: i32, %arg1: i32) -> (i32, i32) {
    %c0_i32 = arith.constant 0 : i32
    %c0_i32_0 = arith.constant 0 : i32
    return %arg0, %c0_i32 : i32, i32
  }
}

</mosaic_0001>

<bundles_post_ra>
// kernel: tpu_custom_call.1
= control target key start
LH: loop header
LB: loop body
LE: loop exit
PB: predicated region body
PF: predicated region fallthrough
CT: control target
= control target key end

     0   :  { %8 = vsyncpa [#allocation3], 0  ;;  %s1280_s0 = inlined_call_operand.hbm [shape: f32[72,128], index: 0, kind: input, shape index: {}]   ;;  %s1281_s1 = inlined_call_operand.hbm [shape: f32[72,128], index: 1, kind: input, shape index: {}]   ;;  %s1282_s2 = inlined_call_operand.hbm [shape: f32[72,128], index: 2, kind: input, shape index: {}]   ;;  %s1283_s3 = inlined_call_operand.hbm [shape: f32[1,1], index: 3, kind: output, shape index: {}]  }
   0x1   :  { %9 = vsyncpa [#allocation6], 0 }
   0x2   :  { %10 = vsyncpa [#allocation4], 0  ;;  %s942_s12 = smov [#allocation5]   ;;  %s943_s14 = smov [#allocation2]  }
   0x3   :  { %s40_s13 = sshll.u32 %s942_s12, 4  ;;  %s22_s15 = sshll.u32 %s943_s14, 4  ;;  %s41_s13 = int_to_ptr.vmem [resolvable:$true] %s40_s13  ;;  %s972_s15 = int_to_ptr.vmem [resolvable:$true] %s22_s15 }
   0x4   :  { %s848_s18 = scalar_lea.hbm %s1281_s1, 1152 }
   0x5   :  { %p849_p0 = scmp.ne.s32.totalorder %s1281_s1, %s848_s18  ;;  %p852_p1 = scmp.lt.u32.totalorder %s848_s18, %s1281_s1 }
   0x7   :  { %p854_p2 = pnand %p852_p1, %p849_p0 }
   0x9   :  { %857 = shalt.err (!%p854_p2)
}
   0xa   :  { %s858_s23 = scalar_lea.vmem %s41_s13, 1152  ;;  %p863_p4 = scmp.lt.s32.totalorder %s41_s13, %s41_s13 }
   0xb   :  { %p859_p3 = scmp.ne.s32.totalorder %s41_s13, %s858_s23  ;;  %p864_p5 = scmp.lt.s32.totalorder %s858_s23, %s858_s23 }
   0xd   :  { %p865_p6 = por %p864_p5, %p863_p4 }
   0xf   :  { %p866_p7 = pnand %p865_p6, %p859_p3 }
  0x11   :  { %869 = shalt.err (!%p866_p7)
}
  0x12   :  { %s944_s24 = smov 128   ;;  %s945_s25 = smov 8  }
  0x13   :  { %46 = dma.hbm_to_vmem [thread:$0]  %s1281_s1, 1152, %s41_s13, [#allocation6], %s944_s24, %s944_s24, %s945_s25  }
  0x14   :  { %s870_s30 = scalar_lea.hbm %s1280_s0, 1152 }
  0x15   :  { %p871_p8 = scmp.ne.s32.totalorder %s1280_s0, %s870_s30  ;;  %p874_p9 = scmp.lt.u32.totalorder %s870_s30, %s1280_s0 }
  0x17   :  { %p876_p10 = pnand %p874_p9, %p871_p8 }
  0x19   :  { %879 = shalt.err (!%p876_p10)
}
  0x1a   :  { %s880_s8 = scalar_lea.vmem %s972_s15, 1152  ;;  %p885_p12 = scmp.lt.s32.totalorder %s972_s15, %s972_s15 }
  0x1b   :  { %p881_p11 = scmp.ne.s32.totalorder %s972_s15, %s880_s8  ;;  %p886_p13 = scmp.lt.s32.totalorder %s880_s8, %s880_s8 }
  0x1d   :  { %p887_p0 = por %p886_p13, %p885_p12 }
  0x1f   :  { %p888_p1 = pnand %p887_p0, %p881_p11 }
  0x21   :  { %891 = shalt.err (!%p888_p1)
}
  0x22   :  { %28 = dma.hbm_to_vmem [thread:$0]  %s1280_s0, 1152, %s972_s15, [#allocation3], %s944_s24, %s944_s24, %s945_s25  }
  0x23   :  { %s946_s10 = smov [#allocation7]   ;;  %s892_s14 = scalar_lea.hbm %s1282_s2, 1152 }
  0x24   :  { %s58_s11 = sshll.u32 %s946_s10, 4  ;;  %p893_p2 = scmp.ne.s32.totalorder %s1282_s2, %s892_s14  ;;  %s59_s11 = int_to_ptr.vmem [resolvable:$true] %s58_s11 }
  0x25   :  { %p896_p3 = scmp.lt.u32.totalorder %s892_s14, %s1282_s2 }
  0x27   :  { %p898_p4 = pnand %p896_p3, %p893_p2 }
  0x29   :  { %901 = shalt.err (!%p898_p4)
}
  0x2a   :  { %s902_s20 = scalar_lea.vmem %s59_s11, 1152  ;;  %p907_p6 = scmp.lt.s32.totalorder %s59_s11, %s59_s11 }
  0x2b   :  { %p903_p5 = scmp.ne.s32.totalorder %s59_s11, %s902_s20  ;;  %p908_p7 = scmp.lt.s32.totalorder %s902_s20, %s902_s20 }
  0x2d   :  { %p909_p8 = por %p908_p7, %p907_p6 }
  0x2f   :  { %p910_p9 = pnand %p909_p8, %p903_p5 }
  0x31   :  { %913 = shalt.err (!%p910_p9)
}
  0x32   :  { %64 = dma.hbm_to_vmem [thread:$0]  %s1282_s2, 1152, %s59_s11, [#allocation6], %s944_s24, %s944_s24, %s945_s25  }
  0x33   :  { %936 = dma.done.wait [#allocation3], 1152  }
  0x34   :  { %937 = vsyncadd [#allocation3], 4294966144 }
  0x35   :  { %938 = dma.done.wait [#allocation6], 2304  }
  0x36   :  { %939 = vsyncadd [#allocation6], 4294964992  ;;  %v947_v0 = vmov 0.0|0.0   ;;  %v948_v1 = vmov 1.0|1.0   ;;  %vm949_vm0 = vmmov 0  }
  0x37   :  { %768 = vmatprep.subr.bf16.mxu0 %v947_v0  ;;  %784 = vmatprep.subr.bf16.mxu1 %v947_v0  ;;  %v950_v2 = vmov 0.0   ;;  %v92_v3 = vld [vmem:[#allocation2] sm:$0xff]  ;;  %v101_v4 = vld [vmem:[#allocation5] sm:$0xff]  ;;  %v110_v5 = vld [vmem:[#allocation7] sm:$0xff]  ;;  %s951_s2 = smov [#allocation8]  }
  0x38   :  { %769 = vmatpush3.bf16.msra.mxu0 %v948_v1  ;;  %785 = vmatpush3.bf16.msra.mxu1 %v948_v1  ;;  %v119_v6 = vsub.f32 %v92_v3, %v101_v4  ;;  %v137_v7 = vsub.f32 %v92_v3, %v110_v5  ;;  %v93_v8 = vld [vmem:[#allocation2 + $0x8] sm:$0xff]  ;;  %v102_v9 = vld [vmem:[#allocation5 + $0x8] sm:$0xff]  ;;  %v111_v10 = vld [vmem:[#allocation7 + $0x8] sm:$0xff]  ;;  %s584_s21 = sshll.u32 %s951_s2, 4  ;;  %s585_s21 = int_to_ptr.vmem [resolvable:$true] %s584_s21 }
  0x39   :  { %770 = vmatprep.subr.bf16.mxu0 %v947_v0  ;;  %786 = vmatprep.subr.bf16.mxu1 %v947_v0  ;;  %v94_v11 = vld [vmem:[#allocation2 + $0x10] sm:$0xff]  ;;  %v120_v14 = vsub.f32 %v93_v8, %v102_v9  ;;  %v138_v15 = vsub.f32 %v93_v8, %v111_v10  ;;  %v103_v16 = vld [vmem:[#allocation5 + $0x10] sm:$0xff]  ;;  %v112_v17 = vld [vmem:[#allocation7 + $0x10] sm:$0xff]  ;;  %s914_s23 = scalar_lea.vmem %s585_s21, 16  ;;  %s918_s24 = scalar_lea.vmem %s585_s21, 32 }
  0x3a   :  { %682 = vmatprep.mubr.msk.f32.mxu0 %vm949_vm0, %v950_v2  ;;  %741 = vmatprep.mubr.msk.f32.mxu1 %vm949_vm0, %v950_v2  ;;  %v128_v12 = vadd.f32 1e-06, %v119_v6  ;;  %v146_v13 = vadd.f32 1e-06, %v137_v7  ;;  %v121_v18 = vsub.f32 %v94_v11, %v103_v16  ;;  %v139_v19 = vsub.f32 %v94_v11, %v112_v17  ;;  %v95_v24 = vld [vmem:[#allocation2 + $0x18] sm:$0xff]  ;;  %v104_v25 = vld [vmem:[#allocation5 + $0x18] sm:$0xff]  ;;  %p915_p10 = scmp.ne.s32.totalorder %s585_s21, %s914_s23  ;;  %p919_p11 = scmp.lt.s32.totalorder %s585_s21, %s585_s21 }
  0x3b   :  { %v129_v22 = vadd.f32 1e-06, %v120_v14  ;;  %v147_v23 = vadd.f32 1e-06, %v138_v15  ;;  %v113_v26 = vld [vmem:[#allocation7 + $0x18] sm:$0xff]  ;;  %v122_v28 = vsub.f32 %v95_v24, %v104_v25  ;;  %v96_v33 = vld [vmem:[#allocation2 + $0x20] sm:$0xff]  ;;  %p920_p12 = scmp.lt.s32.totalorder %s918_s24, %s914_s23 }
  0x3c   :  { %771 = vmatpush3.bf16.msra.mxu0 %v948_v1  ;;  %787 = vmatpush3.bf16.msra.mxu1 %v948_v1  ;;  %v155_v20 = vmul.f32 %v128_v12, %v128_v12  ;;  %v164_v21 = vmul.f32 %v146_v13, %v146_v13  ;;  %v130_v27 = vadd.f32 1e-06, %v121_v18  ;;  %v148_v31 = vadd.f32 1e-06, %v139_v19  ;;  %v105_v34 = vld [vmem:[#allocation5 + $0x20] sm:$0xff]  ;;  %v114_v35 = vld [vmem:[#allocation7 + $0x20] sm:$0xff] }
  0x3d   :  { %772 = vmatprep.subr.bf16.mxu0 %v947_v0  ;;  %788 = vmatprep.subr.bf16.mxu1 %v947_v0  ;;  %v156_v29 = vmul.f32 %v129_v22, %v129_v22  ;;  %v165_v30 = vmul.f32 %v147_v23, %v147_v23  ;;  %v140_v32 = vsub.f32 %v95_v24, %v113_v26  ;;  %v131_v37 = vadd.f32 1e-06, %v122_v28  ;;  %v97_v42 = vld [vmem:[#allocation2 + $0x28] sm:$0xff]  ;;  %v106_v43 = vld [vmem:[#allocation5 + $0x28] sm:$0xff]  ;;  %v115_v44 = vld [vmem:[#allocation7 + $0x28] sm:$0xff]  ;;  %p921_p13 = por %p920_p12, %p919_p11 }
  0x3e   :  { %v157_v36 = vmul.f32 %v130_v27, %v130_v27  ;;  %v166_v38 = vmul.f32 %v148_v31, %v148_v31  ;;  %v123_v40 = vsub.f32 %v96_v33, %v105_v34  ;;  %v141_v41 = vsub.f32 %v96_v33, %v114_v35  ;;  %v98_v47 = vld [vmem:[#allocation2 + $0x30] sm:$0xff]  ;;  %v107_v52 = vld [vmem:[#allocation5 + $0x30] sm:$0xff]  ;;  %v116_v53 = vld [vmem:[#allocation7 + $0x30] sm:$0xff] }
  0x3f   :  { %v149_v39 = vadd.f32 1e-06, %v140_v32  ;;  %v158_v45 = vmul.f32 %v131_v37, %v131_v37  ;;  %v124_v46 = vsub.f32 %v97_v42, %v106_v43  ;;  %v142_v51 = vsub.f32 %v97_v42, %v115_v44  ;;  %v99_v60 = vld [vmem:[#allocation2 + $0x38] sm:$0xff]  ;;  %v108_v61 = vld [vmem:[#allocation5 + $0x38] sm:$0xff]  ;;  %v117_v62 = vld [vmem:[#allocation7 + $0x38] sm:$0xff]  ;;  %p922_p0 = pnand %p921_p13, %p915_p10 }
  0x40   :  { %773 = vmatpush3.bf16.msra.mxu0 %v948_v1  ;;  %789 = vmatpush3.bf16.msra.mxu1 %v948_v1  ;;  %v132_v49 = vadd.f32 1e-06, %v123_v40  ;;  %v150_v50 = vadd.f32 1e-06, %v141_v41  ;;  %v125_v54 = vsub.f32 %v98_v47, %v107_v52  ;;  %v143_v55 = vsub.f32 %v98_v47, %v116_v53  ;;  %v100_v6 = vld [vmem:[#allocation2 + $0x40] sm:$0xff]  ;;  %v109_v7 = vld [vmem:[#allocation5 + $0x40] sm:$0xff] }
  0x41   :  { %774 = vmatprep.subr.bf16.mxu0 %v947_v0  ;;  %790 = vmatprep.subr.bf16.mxu1 %v947_v0  ;;  %v167_v48 = vmul.f32 %v149_v39, %v149_v39  ;;  %v133_v58 = vadd.f32 1e-06, %v124_v46  ;;  %v151_v59 = vadd.f32 1e-06, %v142_v51  ;;  %v144_v5 = vsub.f32 %v99_v60, %v117_v62  ;;  %v118_v8 = vld [vmem:[#allocation7 + $0x40] sm:$0xff] }
  0x42   :  { %v159_v56 = vmul.f32 %v132_v49, %v132_v49  ;;  %v168_v57 = vmul.f32 %v150_v50, %v150_v50  ;;  %v134_v63 = vadd.f32 1e-06, %v125_v54  ;;  %v152_v4 = vadd.f32 1e-06, %v143_v55 }
  0x43   :  { %v169_v3 = vmul.f32 %v151_v59, %v151_v59  ;;  %v153_v12 = vadd.f32 1e-06, %v144_v5  ;;  %v127_v13 = vsub.f32 %v100_v6, %v109_v7  ;;  %v145_v14 = vsub.f32 %v100_v6, %v118_v8 }
  0x44   :  { %775 = vmatpush3.bf16.msra.mxu0 %v948_v1  ;;  %791 = vmatpush3.bf16.msra.mxu1 %v948_v1  ;;  %v161_v9 = vmul.f32 %v134_v63, %v134_v63  ;;  %v170_v11 = vmul.f32 %v152_v4, %v152_v4 }
  0x45   :  { %776 = vmatprep.subr.bf16.mxu0 %v947_v0  ;;  %792 = vmatprep.subr.bf16.mxu1 %v947_v0  ;;  %v171_v16 = vmul.f32 %v153_v12, %v153_v12  ;;  %v136_v17 = vadd.f32 1e-06, %v127_v13  ;;  %v154_v18 = vadd.f32 1e-06, %v145_v14 }
  0x47   :  { %v163_v19 = vmul.f32 %v136_v17, %v136_v17 }
  0x48   :  { %777 = vmatpush3.bf16.msra.mxu0 %v948_v1  ;;  %793 = vmatpush3.bf16.msra.mxu1 %v948_v1 }
  0x49   :  { %778 = vmatprep.subr.bf16.mxu0 %v947_v0  ;;  %794 = vmatprep.subr.bf16.mxu1 %v947_v0 }
  0x4c   :  { %779 = vmatpush3.bf16.msra.mxu0 %v948_v1  ;;  %795 = vmatpush3.bf16.msra.mxu1 %v948_v1 }
  0x4d   :  { %780 = vmatprep.subr.bf16.mxu0 %v947_v0  ;;  %796 = vmatprep.subr.bf16.mxu1 %v947_v0 }
  0x50   :  { %781 = vmatpush3.bf16.msra.mxu0 %v948_v1  ;;  %797 = vmatpush3.bf16.msra.mxu1 %v948_v1 }
  0x51   :  { %782 = vmatprep.subr.bf16.mxu0 %v947_v0  ;;  %798 = vmatprep.subr.bf16.mxu1 %v947_v0  ;;  %v126_v0 = vsub.f32 %v99_v60, %v108_v61 }
  0x53   :  { %v135_v10 = vadd.f32 1e-06, %v126_v0 }
  0x54   :  { %783 = vmatpush3.bf16.msra.mxu0 %v948_v1  ;;  %799 = vmatpush3.bf16.msra.mxu1 %v948_v1  ;;  %v160_v1 = vmul.f32 %v133_v58, %v133_v58 }
  0x55   :  { %v162_v15 = vmul.f32 %v135_v10, %v135_v10 }
  0x57   :  { %683 = vmatmul.mubr.f32.vlgmr.msra.gmra.mrb[0].mxu0 %v155_v20  ;;  %742 = vmatmul.mubr.f32.vlgmr.msra.gmra.mrb[0].mxu1 %v164_v21  ;;  %v172_v20 = vmul.f32 %v154_v18, %v154_v18 }
  0x58   :  { %685 = vmatprep.mubr.msk.f32.mxu0 %vm949_vm0, %v950_v2  ;;  %744 = vmatprep.mubr.msk.f32.mxu1 %vm949_vm0, %v950_v2 }
  0x5b   :  { %686 = vmatmul.mubr.f32.gmra.mrb[2].mxu0 %v156_v29  ;;  %745 = vmatmul.mubr.f32.gmra.mrb[2].mxu1 %v165_v30 }
  0x5c   :  { %688 = vmatprep.mubr.msk.f32.mxu0 %vm949_vm0, %v950_v2  ;;  %747 = vmatprep.mubr.msk.f32.mxu1 %vm949_vm0, %v950_v2 }
  0x5f   :  { %689 = vmatmul.mubr.f32.gmra.mrb[4].mxu0 %v157_v36  ;;  %748 = vmatmul.mubr.f32.gmra.mrb[4].mxu1 %v166_v38 }
  0x60   :  { %691 = vmatprep.mubr.msk.f32.mxu0 %vm949_vm0, %v950_v2  ;;  %750 = vmatprep.mubr.msk.f32.mxu1 %vm949_vm0, %v950_v2 }
  0x63   :  { %692 = vmatmul.mubr.f32.gmra.mrb[6].mxu0 %v158_v45  ;;  %751 = vmatmul.mubr.f32.gmra.mrb[6].mxu1 %v167_v48 }
  0x64   :  { %694 = vmatprep.mubr.msk.f32.mxu0 %vm949_vm0, %v950_v2  ;;  %753 = vmatprep.mubr.msk.f32.mxu1 %vm949_vm0, %v950_v2 }
  0x67   :  { %695 = vmatmul.mubr.f32.gmra.mrb[8].mxu0 %v159_v56  ;;  %754 = vmatmul.mubr.f32.gmra.mrb[8].mxu1 %v168_v57 }
  0x68   :  { %697 = vmatprep.mubr.msk.f32.mxu0 %vm949_vm0, %v950_v2  ;;  %756 = vmatprep.mubr.msk.f32.mxu1 %vm949_vm0, %v950_v2 }
  0x6b   :  { %698 = vmatmul.mubr.f32.gmra.mrb[10].mxu0 %v160_v1  ;;  %757 = vmatmul.mubr.f32.gmra.mrb[10].mxu1 %v169_v3 }
  0x6c   :  { %700 = vmatprep.mubr.msk.f32.mxu0 %vm949_vm0, %v950_v2  ;;  %759 = vmatprep.mubr.msk.f32.mxu1 %vm949_vm0, %v950_v2 }
  0x6f   :  { %701 = vmatmul.mubr.f32.gmra.mrb[12].mxu0 %v161_v9  ;;  %760 = vmatmul.mubr.f32.gmra.mrb[12].mxu1 %v170_v11 }
  0x70   :  { %703 = vmatprep.mubr.msk.f32.mxu0 %vm949_vm0, %v950_v2  ;;  %762 = vmatprep.mubr.msk.f32.mxu1 %vm949_vm0, %v950_v2 }
  0x73   :  { %704 = vmatmul.mubr.f32.gmra.mrb[14].mxu0 %v162_v15  ;;  %763 = vmatmul.mubr.f32.gmra.mrb[14].mxu1 %v171_v16 }
  0x74   :  { %706 = vmatprep.mubr.msk.f32.mxu0 %vm949_vm0, %v950_v2  ;;  %765 = vmatprep.mubr.msk.f32.mxu1 %vm949_vm0, %v950_v2 }
  0x77   :  { %707 = vmatmul.mubr.f32.gmra.mrb[16].mxu0 %v163_v19  ;;  %766 = vmatmul.mubr.f32.gmra.mrb[16].mxu1 %v172_v20 }
 0x12a   :  { %v239_v21 = vpop.f32.mrb[0].mxu0  ;;  %v349_v22 = vpop.f32.mrb[0].mxu1 }
 0x12b   :  { %812 = vrsqrt.f32 %v239_v21  ;;  %v684_v23 = vpop.f32.mrb[1].mxu0  ;;  %v743_v24 = vpop.f32.mrb[1].mxu1  ;;  %vm395_vm1 = vcmp.eq.f32.partialorder %v239_v21, inf  ;;  %vm397_vm2 = vcmp.eq.f32.partialorder %v239_v21, 0.0  ;;  %v398_v34 = vand.u32 2147483648, %v239_v21 }
 0x12c   :  { %814 = vrsqrt.f32 %v349_v22  ;;  %vm458_vm3 = vcmp.eq.f32.partialorder %v349_v22, inf  ;;  %vm460_vm4 = vcmp.eq.f32.partialorder %v349_v22, 0.0  ;;  %v461_v37 = vand.u32 2147483648, %v349_v22 }
 0x12e   :  { %v244_v25 = vpop.f32.mrb[2].mxu0  ;;  %v1060_v26 = vpop.f32.mrb[2].mxu1 }
 0x12f   :  { %816 = vrsqrt.f32 %v244_v25  ;;  %v687_v27 = vpop.f32.mrb[3].mxu0  ;;  %v746_v28 = vpop.f32.mrb[3].mxu1  ;;  %vm402_vm5 = vcmp.eq.f32.partialorder %v244_v25, inf  ;;  %vm404_vm6 = vcmp.eq.f32.partialorder %v244_v25, 0.0  ;;  %v405_v41 = vand.u32 2147483648, %v244_v25 }
 0x130   :  { %818 = vrsqrt.f32 %v1060_v26  ;;  %vm465_vm7 = vcmp.eq.f32.partialorder %v1060_v26, inf  ;;  %vm467_vm8 = vcmp.eq.f32.partialorder %v1060_v26, 0.0  ;;  %v468_v48 = vand.u32 2147483648, %v1060_v26 }
 0x132   :  { %v1063_v29 = vpop.f32.mrb[4].mxu0  ;;  %v1065_v30 = vpop.f32.mrb[4].mxu1 }
 0x133   :  { %820 = vrsqrt.f32 %v1063_v29  ;;  %v690_v31 = vpop.f32.mrb[5].mxu0  ;;  %v749_v32 = vpop.f32.mrb[5].mxu1  ;;  %vm409_vm9 = vcmp.eq.f32.partialorder %v1063_v29, inf  ;;  %vm411_vm10 = vcmp.eq.f32.partialorder %v1063_v29, 0.0  ;;  %v412_v52 = vand.u32 2147483648, %v1063_v29 }
 0x134   :  { %822 = vrsqrt.f32 %v1065_v30  ;;  %vm472_vm11 = vcmp.eq.f32.partialorder %v1065_v30, inf  ;;  %vm474_vm12 = vcmp.eq.f32.partialorder %v1065_v30, 0.0  ;;  %v475_v60 = vand.u32 2147483648, %v1065_v30 }
 0x135   :  { %v813_v33 = vpop.eup %812 }
 0x136   :  { %v815_v35 = vpop.eup %814  ;;  %v394_v36 = vmul.f32 %v813_v33, %v239_v21  ;;  %v1069_v38 = vpop.f32.mrb[6].mxu0 }
 0x137   :  { %v1071_v39 = vpop.f32.mrb[6].mxu1  ;;  %v457_v40 = vmul.f32 %v815_v35, %v349_v22  ;;  %824 = vrsqrt.f32 %v1069_v38  ;;  %v693_v42 = vpop.f32.mrb[7].mxu0  ;;  %vm416_vm13 = vcmp.eq.f32.partialorder %v1069_v38, inf  ;;  %v419_v0 = vand.u32 2147483648, %v1069_v38 }
 0x138   :  { %v752_v43 = vpop.f32.mrb[7].mxu1  ;;  %v396_v44 = vsel %vm395_vm1, %v239_v21, %v394_v36  ;;  %826 = vrsqrt.f32 %v1071_v39  ;;  %vm418_vm14 = vcmp.eq.f32.partialorder %v1069_v38, 0.0  ;;  %vm479_vm15 = vcmp.eq.f32.partialorder %v1071_v39, inf }
 0x139   :  { %v817_v45 = vpop.eup %816  ;;  %v399_v46 = vsel %vm397_vm2, %v398_v34, %v396_v44  ;;  %v459_v47 = vsel %vm458_vm3, %v349_v22, %v457_v40  ;;  %vm481_vm0 = vcmp.eq.f32.partialorder %v1071_v39, 0.0  ;;  %v482_v13 = vand.u32 2147483648, %v1071_v39 }
 0x13a   :  { %v819_v49 = vpop.eup %818  ;;  %v462_v50 = vsel %vm460_vm4, %v461_v37, %v459_v47  ;;  %v401_v51 = vmul.f32 %v817_v45, %v244_v25  ;;  %v1085_v53 = vpop.f32.mrb[8].mxu0 }
 0x13b   :  { %v1087_v54 = vpop.f32.mrb[8].mxu1  ;;  %v519_v55 = vsub.f32 %v399_v46, %v462_v50  ;;  %v464_v56 = vmul.f32 %v819_v49, %v1060_v26  ;;  %828 = vrsqrt.f32 %v1085_v53  ;;  %v696_v57 = vpop.f32.mrb[9].mxu0  ;;  %vm423_vm1 = vcmp.eq.f32.partialorder %v1085_v53, inf }
 0x13c   :  { %v755_v58 = vpop.f32.mrb[9].mxu1  ;;  %v403_v59 = vsel %vm402_vm5, %v244_v25, %v401_v51  ;;  %830 = vrsqrt.f32 %v1087_v54  ;;  %v426_v14 = vand.u32 2147483648, %v1085_v53  ;;  %vm425_vm2 = vcmp.eq.f32.partialorder %v1085_v53, 0.0 }
 0x13d   :  { %v821_v61 = vpop.eup %820  ;;  %v406_v62 = vsel %vm404_vm6, %v405_v41, %v403_v59  ;;  %v466_v63 = vsel %vm465_vm7, %v1060_v26, %v464_v56  ;;  %v1112_v7 = vadd.f32 1.0, %v519_v55  ;;  %vm486_vm3 = vcmp.eq.f32.partialorder %v1087_v54, inf }
 0x13e   :  { %v823_v1 = vpop.eup %822  ;;  %v469_v3 = vsel %vm467_vm8, %v468_v48, %v466_v63  ;;  %v408_v4 = vmul.f32 %v821_v61, %v1063_v29  ;;  %v1108_v5 = vpop.f32.mrb[10].mxu0  ;;  %vm488_vm4 = vcmp.eq.f32.partialorder %v1087_v54, 0.0  ;;  %v489_v27 = vand.u32 2147483648, %v1087_v54 }
 0x13f   :  { %v1110_v6 = vpop.f32.mrb[10].mxu1  ;;  %v520_v8 = vsub.f32 %v406_v62, %v469_v3  ;;  %v471_v9 = vmul.f32 %v823_v1, %v1065_v30  ;;  %832 = vrsqrt.f32 %v1108_v5  ;;  %v699_v10 = vpop.f32.mrb[11].mxu0  ;;  %v537_v24 = vmax.f32 %v1112_v7, 0.0 }
 0x140   :  { %v758_v11 = vpop.f32.mrb[11].mxu1  ;;  %v410_v12 = vsel %vm409_vm9, %v1063_v29, %v408_v4  ;;  %834 = vrsqrt.f32 %v1110_v6  ;;  %vm547_vm5 = vcmask 7168   ;;  %vm430_vm6 = vcmp.eq.f32.partialorder %v1108_v5, inf }
 0x141   :  { %v825_v15 = vpop.eup %824  ;;  %v1124_v16 = vsel %vm411_vm10, %v412_v52, %v410_v12  ;;  %v473_v17 = vsel %vm472_vm11, %v1065_v30, %v471_v9  ;;  %v1132_v19 = vadd.f32 1.0, %v520_v8  ;;  %vm432_vm7 = vcmp.eq.f32.partialorder %v1108_v5, 0.0 }
 0x142   :  { %v827_v18 = vpop.eup %826  ;;  %v1136_v20 = vsel %vm474_vm12, %v475_v60, %v473_v17  ;;  %v415_v21 = vmul.f32 %v825_v15, %v1069_v38  ;;  %v1140_v22 = vpop.f32.mrb[12].mxu0  ;;  %v433_v33 = vand.u32 2147483648, %v1108_v5  ;;  %vm493_vm8 = vcmp.eq.f32.partialorder %v1110_v6, inf }
 0x143   :  { %v1142_v23 = vpop.f32.mrb[12].mxu1  ;;  %v521_v25 = vsub.f32 %v1124_v16, %v1136_v20  ;;  %v478_v26 = vmul.f32 %v827_v18, %v1071_v39  ;;  %v702_v28 = vpop.f32.mrb[13].mxu0  ;;  %836 = vrsqrt.f32 %v1140_v22  ;;  %v538_v35 = vmax.f32 %v1132_v19, 0.0 }
 0x144   :  { %v761_v29 = vpop.f32.mrb[13].mxu1  ;;  %v417_v30 = vsel %vm416_vm13, %v1069_v38, %v415_v21  ;;  %838 = vrsqrt.f32 %v1142_v23  ;;  %vm495_vm9 = vcmp.eq.f32.partialorder %v1110_v6, 0.0  ;;  %v496_v37 = vand.u32 2147483648, %v1110_v6 }
 0x145   :  { %v829_v31 = vpop.eup %828  ;;  %v480_v32 = vsel %vm479_vm15, %v1071_v39, %v478_v26  ;;  %v420_v42 = vsel %vm418_vm14, %v419_v0, %v417_v30  ;;  %vm437_vm10 = vcmp.eq.f32.partialorder %v1140_v22, inf  ;;  %v440_v48 = vand.u32 2147483648, %v1140_v22 }
 0x146   :  { %v831_v34 = vpop.eup %830  ;;  %v422_v36 = vmul.f32 %v829_v31, %v1085_v53  ;;  %v1165_v40 = vpop.f32.mrb[14].mxu0  ;;  %v483_v43 = vsel %vm481_vm0, %v482_v13, %v480_v32  ;;  %vm500_vm11 = vcmp.eq.f32.partialorder %v1142_v23, inf  ;;  %v503_v49 = vand.u32 2147483648, %v1142_v23 }
 0x147   :  { %v1167_v41 = vpop.f32.mrb[14].mxu1  ;;  %v485_v44 = vmul.f32 %v831_v34, %v1087_v54  ;;  %840 = vrsqrt.f32 %v1165_v40  ;;  %v705_v45 = vpop.f32.mrb[15].mxu0  ;;  %vm439_vm12 = vcmp.eq.f32.partialorder %v1140_v22, 0.0  ;;  %v522_v57 = vsub.f32 %v420_v42, %v483_v43 }
 0x148   :  { %v764_v46 = vpop.f32.mrb[15].mxu1  ;;  %v424_v47 = vsel %vm423_vm1, %v1085_v53, %v422_v36  ;;  %842 = vrsqrt.f32 %v1167_v41  ;;  %vm444_vm13 = vcmp.eq.f32.partialorder %v1165_v40, inf  ;;  %v447_v61 = vand.u32 2147483648, %v1165_v40 }
 0x149   :  { %v833_v38 = vpop.eup %832  ;;  %v487_v39 = vsel %vm486_vm3, %v1087_v54, %v485_v44  ;;  %v427_v55 = vsel %vm425_vm2, %v426_v14, %v424_v47  ;;  %vm502_vm14 = vcmp.eq.f32.partialorder %v1142_v23, 0.0  ;;  %vm446_vm15 = vcmp.eq.f32.partialorder %v1165_v40, 0.0 }
 0x14a   :  { %v429_v50 = vmul.f32 %v833_v38, %v1108_v5  ;;  %v1188_v51 = vpop.f32.mrb[16].mxu0  ;;  %v1190_v52 = vpop.f32.mrb[16].mxu1  ;;  %v490_v56 = vsel %vm488_vm4, %v489_v27, %v487_v39  ;;  %vm507_vm0 = vcmp.eq.f32.partialorder %v1167_v41, inf  ;;  %vm509_vm1 = vcmp.eq.f32.partialorder %v1167_v41, 0.0 }
 0x14b   :  { %v835_v58 = vpop.eup %834  ;;  %844 = vrsqrt.f32 %v1188_v51  ;;  %v708_v59 = vpop.f32.mrb[17].mxu0  ;;  %v510_v63 = vand.u32 2147483648, %v1167_v41  ;;  %v523_v0 = vsub.f32 %v427_v55, %v490_v56  ;;  %v530_v4 = vadd.f32 1.0, %v521_v25 }
 0x14c   :  { %v767_v60 = vpop.f32.mrb[17].mxu1  ;;  %v431_v53 = vsel %vm430_vm6, %v1108_v5, %v429_v50  ;;  %v492_v62 = vmul.f32 %v835_v58, %v1110_v6  ;;  %846 = vrsqrt.f32 %v1190_v52  ;;  %v531_v8 = vadd.f32 1.0, %v522_v57 }
 0x14d   :  { %v434_v54 = vsel %vm432_vm7, %v433_v33, %v431_v53  ;;  %v837_v1 = vpop.eup %836  ;;  %v548_v9 = vsel %vm547_vm5, %v537_v24, 0.0  ;;  %vm451_vm2 = vcmp.eq.f32.partialorder %v1188_v51, inf  ;;  %v532_v12 = vadd.f32 1.0, %v523_v0 }
 0x14e   :  { %v494_v3 = vsel %vm493_vm8, %v1110_v6, %v492_v62  ;;  %v839_v10 = vpop.eup %838  ;;  %v436_v5 = vmul.f32 %v837_v1, %v1140_v22  ;;  %v549_v13 = vsel %vm547_vm5, %v538_v35, 0.0  ;;  %v539_v16 = vmax.f32 %v530_v4, 0.0 }
 0x14f   :  { %v497_v11 = vsel %vm495_vm9, %v496_v37, %v494_v3  ;;  %v499_v14 = vmul.f32 %v839_v10, %v1142_v23  ;;  %v540_v17 = vmax.f32 %v531_v8, 0.0  ;;  %vm453_vm3 = vcmp.eq.f32.partialorder %v1188_v51, 0.0 }
 0x150   :  { %v524_v15 = vsub.f32 %v434_v54, %v497_v11  ;;  %v438_v7 = vsel %vm437_vm10, %v1140_v22, %v436_v5  ;;  %v541_v19 = vmax.f32 %v532_v12, 0.0  ;;  %v550_v20 = vadd.f32 %v549_v13, %v548_v9 }
 0x151   :  { %v841_v18 = vpop.eup %840  ;;  %v441_v24 = vsel %vm439_vm12, %v440_v48, %v438_v7  ;;  %v501_v25 = vsel %vm500_vm11, %v1142_v23, %v499_v14  ;;  %v551_v29 = vsel %vm547_vm5, %v539_v16, 0.0  ;;  %v553_v30 = vsel %vm547_vm5, %v540_v17, 0.0 }
 0x152   :  { %v843_v21 = vpop.eup %842  ;;  %v443_v6 = vmul.f32 %v841_v18, %v1165_v40  ;;  %v533_v26 = vadd.f32 1.0, %v524_v15  ;;  %v504_v28 = vsel %vm502_vm14, %v503_v49, %v501_v25  ;;  %v552_v33 = vadd.f32 %v551_v29, %v550_v20 }
 0x153   :  { %v506_v27 = vmul.f32 %v843_v21, %v1167_v41  ;;  %v525_v22 = vsub.f32 %v441_v24, %v504_v28  ;;  %v454_v36 = vand.u32 2147483648, %v1188_v51  ;;  %v555_v37 = vsel %vm547_vm5, %v541_v19, 0.0 }
 0x154   :  { %v445_v31 = vsel %vm444_vm13, %v1165_v40, %v443_v6  ;;  %v542_v32 = vmax.f32 %v533_v26, 0.0  ;;  %v554_v46 = vadd.f32 %v553_v30, %v552_v33  ;;  %vm514_vm4 = vcmp.eq.f32.partialorder %v1190_v52, inf }
 0x155   :  { %v845_v34 = vpop.eup %844  ;;  %v448_v35 = vsel %vm446_vm15, %v447_v61, %v445_v31  ;;  %v508_v23 = vsel %vm507_vm0, %v1167_v41, %v506_v27  ;;  %v534_v45 = vadd.f32 1.0, %v525_v22  ;;  %v517_v39 = vand.u32 2147483648, %v1190_v52 }
 0x156   :  { %v847_v42 = vpop.eup %846  ;;  %v450_v43 = vmul.f32 %v845_v34, %v1188_v51  ;;  %v511_v44 = vsel %vm509_vm1, %v510_v63, %v508_v23  ;;  %v557_v48 = vsel %vm547_vm5, %v542_v32, 0.0  ;;  %v556_v50 = vadd.f32 %v555_v37, %v554_v46 }
 0x157   :  { %v513_v47 = vmul.f32 %v847_v42, %v1190_v52  ;;  %v526_v40 = vsub.f32 %v448_v35, %v511_v44  ;;  %v543_v49 = vmax.f32 %v534_v45, 0.0  ;;  %vm516_vm6 = vcmp.eq.f32.partialorder %v1190_v52, 0.0 }
 0x158   :  { %v452_v38 = vsel %vm451_vm2, %v1188_v51, %v450_v43  ;;  %v558_v58 = vadd.f32 %v557_v48, %v556_v50  ;;  %vm90_vm7 = vcmask 0  }
 0x159   :  { %v455_v41 = vsel %vm453_vm3, %v454_v36, %v452_v38  ;;  %v515_v55 = vsel %vm514_vm4, %v1190_v52, %v513_v47  ;;  %v535_v56 = vadd.f32 1.0, %v526_v40  ;;  %v559_v59 = vsel %vm547_vm5, %v543_v49, 0.0  ;;  %91 = vst.msk [vmem:[#allocation8] sm:$0x1] %vm90_vm7, %v950_v2 }
 0x15a   :  { %v518_v57 = vsel %vm516_vm6, %v517_v39, %v515_v55  ;;  %v560_v53 = vadd.f32 %v559_v59, %v558_v58 }
 0x15b   :  { %v527_v60 = vsub.f32 %v455_v41, %v518_v57  ;;  %v544_v61 = vmax.f32 %v535_v56, 0.0 }
 0x15d   :  { %v536_v62 = vadd.f32 1.0, %v527_v60  ;;  %v561_v54 = vsel %vm547_vm5, %v544_v61, 0.0 }
 0x15e   :  { %v562_v63 = vadd.f32 %v561_v54, %v560_v53 }
 0x15f   :  { %v545_v0 = vmax.f32 %v536_v62, 0.0 }
 0x160   :  { %v546_v11 = vld [vmem:[#allocation8] sm:$0x1] }
 0x161   :  { %v563_v51 = vsel %vm547_vm5, %v545_v0, 0.0 }
 0x162   :  { %v564_v1 = vadd.f32 %v563_v51, %v562_v63 }
 0x164   :  { %565 = vadd.xlane.f32.xlu0 %v564_v1 }
 0x1f1   :  { %v566_v52 = vpop.xlane.xlu0 %565 }
 0x1f2   :  { %v567_v3 = vrot.slane %v566_v52, 4 }
 0x1f4   :  { %v568_v4 = vadd.f32 %v567_v3, %v566_v52 }
 0x1f6   :  { %v569_v8 = vrot.slane %v568_v4, 2 }
 0x1f8   :  { %v570_v9 = vadd.f32 %v569_v8, %v568_v4 }
 0x1fa   :  { %v571_v10 = vrot.slane %v570_v9, 1 }
 0x1fc   :  { %v572_v5 = vadd.f32 %v571_v10, %v570_v9 }
 0x1fe   :  { %800 = vpush %v572_v5 }
 0x22f   :  { %s801_s22 = spop %800 }
 0x230   :  { %v574_v12 = vstv %s801_s22 }
 0x231   :  { %v575_v13 = vadd.f32 %v574_v12, %v546_v11 }
 0x233   :  { %577 = vst.msk [vmem:[#allocation8] sm:$0x1] %vm90_vm7, %v575_v13 }
 0x234   :  { %925 = shalt.err (!%p922_p0)
}
 0x235   :  { %s926_s27 = scalar_lea.hbm %s1283_s3, 16 }
 0x236   :  { %p927_p1 = scmp.ne.s32.totalorder %s1283_s3, %s926_s27  ;;  %p930_p2 = scmp.lt.u32.totalorder %s926_s27, %s1283_s3 }
 0x238   :  { %p932_p3 = pnand %p930_p2, %p927_p1 }
 0x23a   :  { %935 = shalt.err (!%p932_p3)
}
 0x23b   :  { %587 = dma.vmem_to_hbm [thread:$0]  %s585_s21, 16, %s1283_s3, [#allocation4]  }
 0x23c   :  { %940 = dma.done.wait [#allocation4], 16  }
 0x23d   :  { %941 = vsyncadd [#allocation4], 4294967280 }
 0x23e   :  { %591 = vsyncpa [#allocation3], 1 }
 0x23f   :  { %592 = vsyncpa [#allocation6], 1 }
 0x240   :  { %593 = vsyncpa [#allocation4], 1 }

</bundles_post_ra>
